<compile_context>
chip_gen: v7x
topology: tpu7x:2x2x1
jax: 0.10.0
libtpu: 0.0.40
codegen_flags: <defaults>
</compile_context>

<pallas_src>
import functools

import jax
import jax.numpy as jnp
from jax.experimental import pallas as pl
from jax.experimental.pallas import tpu as pltpu


def _attention_gate_kernel(x_ref, g_ref, wc_ref, b_ref, wa_ref, ba_ref, out_ref,
                           *, chunk):
    """One (batch, spatial-tile) grid step.

    x_ref/out_ref: (C_in, TS)    g_ref: (C_gate, TS)          lane axis = spatial
    wc_ref: (C_int, C_in+C_gate) b_ref/wa_ref: (C_int, 1)     ba_ref: (1, 1)
    """
    ts = x_ref.shape[-1]
    n_chunks = ts // chunk
    c_int = wc_ref.shape[0]

    wc = wc_ref[...]                                      # (C_int, C_in+C_gate), f32
    # Hoisted lane-broadcasts (JAX does not CSE broadcast_in_dim -> keep them out
    # of the chunk loop).
    bb = jnp.broadcast_to(b_ref[...], (c_int, chunk))     # fused bias (bf + bg)
    wab = jnp.broadcast_to(wa_ref[...], (c_int, chunk))   # attention weights, column
    bab = jnp.broadcast_to(ba_ref[...], (1, chunk))       # attention bias

    def compute(off):
        x = x_ref[:, pl.ds(off, chunk)].astype(jnp.float32)    # (C_in,  chunk)
        g = g_ref[:, pl.ds(off, chunk)].astype(jnp.float32)    # (C_gate, chunk)
        # Fused 1x1 convs: one thin MXU matmul over the stacked channels.
        xg = jnp.concatenate([x, g], axis=0)                   # (C_in+C_gate, chunk)
        h = jnp.maximum(
            jnp.dot(wc, xg, preferred_element_type=jnp.float32) + bb, 0.0)
        # 64 -> 1 projection as VPU mul + sublane reduce (avoids a 2nd MXU pass).
        logit = jnp.sum(h * wab, axis=0, keepdims=True) + bab  # (1, chunk)
        attn = jax.nn.sigmoid(logit)                           # EUP
        # Gate the input; attn broadcasts over the channel (sublane) axis.
        out_ref[:, pl.ds(off, chunk)] = (x * attn).astype(out_ref.dtype)

    if n_chunks == 1:
        compute(0)
    else:
        @pl.loop(0, n_chunks)
        def _(ci):
            compute(pl.multiple_of(ci * chunk, chunk))


def attention_gate(x, gate_signal, params, *, tile_s=65536, chunk_s=2048):
    """x: (N, C_in, H, W), gate_signal: (N, C_gate, H, W)  -- NCHW like PyTorch."""
    wf, bf, wg, bg, wa, ba = params
    N, C_in, H, W = x.shape
    _, C_gate, _, _ = gate_signal.shape
    C_int = bf.shape[0]
    S = H * W

    # Free reshapes (no transpose): channel-major, spatial-last.
    x_flat = x.reshape(N, C_in, S)
    g_flat = gate_signal.reshape(N, C_gate, S)

    # Spatial DMA tile: as large as comfortably fits, divides S, lane-aligned.
    tile_s = min(tile_s, S)
    while S % tile_s:
        tile_s //= 2
    if tile_s % 128 != 0:
        tile_s = S                       # full-extent block is always legal

    # In-kernel compute chunk: bounds the (C_int, chunk) intermediates in VMEM.
    chunk = min(chunk_s, tile_s)
    while tile_s % chunk:
        chunk //= 2

    # Tiny resident weights (f32): fuse the two convs and their biases.
    wf2 = wf.reshape(C_int, C_in).astype(jnp.float32)
    wg2 = wg.reshape(C_int, C_gate).astype(jnp.float32)
    wc = jnp.concatenate([wf2, wg2], axis=1)             # (C_int, C_in + C_gate)
    b = (bf + bg).reshape(C_int, 1).astype(jnp.float32)  # fused conv biases
    wa_col = wa.reshape(C_int, 1).astype(jnp.float32)    # (1,C_int) -> column
    ba2 = ba.reshape(1, 1).astype(jnp.float32)

    grid = (N, S // tile_s)

    out_flat = pl.pallas_call(
        functools.partial(_attention_gate_kernel, chunk=chunk),
        out_shape=jax.ShapeDtypeStruct((N, C_in, S), x.dtype),
        grid_spec=pltpu.PrefetchScalarGridSpec(
            num_scalar_prefetch=0,
            grid=grid,
            in_specs=[
                pl.BlockSpec((None, C_in, tile_s), lambda n, s: (n, 0, s)),    # x
                pl.BlockSpec((None, C_gate, tile_s), lambda n, s: (n, 0, s)),  # gate
                pl.BlockSpec((C_int, C_in + C_gate), lambda n, s: (0, 0)),     # [Wf|Wg]
                pl.BlockSpec((C_int, 1), lambda n, s: (0, 0)),                 # bf+bg
                pl.BlockSpec((C_int, 1), lambda n, s: (0, 0)),                 # Wa
                pl.BlockSpec((1, 1), lambda n, s: (0, 0)),                     # ba
            ],
            out_specs=pl.BlockSpec((None, C_in, tile_s), lambda n, s: (n, 0, s)),
        ),
        compiler_params=pltpu.CompilerParams(
            dimension_semantics=("parallel", "parallel"),
            vmem_limit_bytes=32 * 1024 * 1024,
        ),
    )(x_flat, g_flat, wc, b, wa_col, ba2)

    return out_flat.reshape(N, C_in, H, W)


def init_params(key, in_channels, gate_channels, intermediate_channels):
    """Synthetic weights in PyTorch Conv2d(k=1) layout: W (out, in), b (out,)."""
    k1, k2, k3, k4, k5, k6 = jax.random.split(key, 6)
    wf = jax.random.normal(k1, (intermediate_channels, in_channels), jnp.float32) * 0.1
    bf = jax.random.normal(k2, (intermediate_channels,), jnp.float32) * 0.1
    wg = jax.random.normal(k3, (intermediate_channels, gate_channels), jnp.float32) * 0.1
    bg = jax.random.normal(k4, (intermediate_channels,), jnp.float32) * 0.1
    wa = jax.random.normal(k5, (1, intermediate_channels), jnp.float32) * 0.1
    ba = jax.random.normal(k6, (1,), jnp.float32) * 0.1
    return wf, bf, wg, bg, wa, ba


def attention_gate_ref(x, gate_signal, params):
    """Pure-JAX reference mirroring the PyTorch forward (NCHW), exact f32 matmuls."""
    wf, bf, wg, bg, wa, ba = params
    hp = jax.lax.Precision.HIGHEST
    feat = jnp.einsum("oi,nihw->nohw", wf, x, precision=hp) + bf[None, :, None, None]
    gate = (jnp.einsum("oi,nihw->nohw", wg, gate_signal, precision=hp)
            + bg[None, :, None, None])
    h = jnp.maximum(feat + gate, 0.0)
    logit = jnp.einsum("oi,nihw->nohw", wa, h, precision=hp) + ba[None, :, None, None]
    return x * jax.nn.sigmoid(logit)


def _check(x, gate_signal, params):
    out = jax.block_until_ready(attention_gate(x, gate_signal, params))
    ref = attention_gate_ref(x, gate_signal, params)
    assert out.shape == x.shape
    err = float(jnp.max(jnp.abs(out - ref)))
    assert jnp.allclose(out, ref, atol=1e-4, rtol=1e-4), err
    return err


if __name__ == "__main__":
    key = jax.random.PRNGKey(0)
    kx, kg, kx2, kg2, kp = jax.random.split(key, 5)

    # Matches the module's AttentionGate(4, 4, 64).
    N, C_in, C_gate, C_int = 2, 4, 4, 64
    params = init_params(kp, C_in, C_gate, C_int)

    # Small spatial size (single chunk, single tile).
    x = jax.random.normal(kx, (N, C_in, 16, 16), jnp.float32)
    g = jax.random.normal(kg, (N, C_gate, 16, 16), jnp.float32)
    _check(x, g, params)

    # Mid-res size used by the model (64x64) -- exercises the in-kernel chunk loop.
    x2 = jax.random.normal(kx2, (N, C_in, 64, 64), jnp.float32)
    g2 = jax.random.normal(kg2, (N, C_gate, 64, 64), jnp.float32)
    _check(x2, g2, params)

    print("KERNEL_OK")
</pallas_src>

<mosaic_0001>
module attributes {stable_mosaic.version = 11 : i64} {
  func.func @_attention_gate_kernel(%arg0: i32, %arg1: i32, %arg2: memref<1x4x256xf32, #tpu.memory_space<vmem>>, %arg3: memref<1x4x256xf32, #tpu.memory_space<vmem>>, %arg4: memref<64x8xf32, #tpu.memory_space<vmem>>, %arg5: memref<64x1xf32, #tpu.memory_space<vmem>>, %arg6: memref<64x1xf32, #tpu.memory_space<vmem>>, %arg7: memref<1x1xf32, #tpu.memory_space<vmem>>, %arg8: memref<1x4x256xf32, #tpu.memory_space<vmem>>) attributes {dimension_semantics = [#tpu.dimension_semantics<parallel>, #tpu.dimension_semantics<parallel>], iteration_bounds = array<i64: 2, 1>, scalar_prefetch = 0 : i64, scratch_operands = 0 : i64, tpu.core_type = #tpu.core_type<tc>, window_params = [{transform_indices = @transform_0, window_bounds = array<i64: 1, 4, 256>}, {transform_indices = @transform_1, window_bounds = array<i64: 1, 4, 256>}, {pipeline_mode = #tpu.pipeline_mode<synchronous>, transform_indices = @transform_2, window_bounds = array<i64: 64, 8>}, {pipeline_mode = #tpu.pipeline_mode<synchronous>, transform_indices = @transform_3, window_bounds = array<i64: 64, 1>}, {pipeline_mode = #tpu.pipeline_mode<synchronous>, transform_indices = @transform_4, window_bounds = array<i64: 64, 1>}, {pipeline_mode = #tpu.pipeline_mode<synchronous>, transform_indices = @transform_5, window_bounds = array<i64: 1, 1>}, {transform_indices = @transform_6, window_bounds = array<i64: 1, 4, 256>}]} {
    %c0 = arith.constant 0 : index
    %c0_0 = arith.constant 0 : index
    %0 = vector.load %arg4[%c0, %c0_0] : memref<64x8xf32, #tpu.memory_space<vmem>>, vector<64x8xf32>
    %c0_1 = arith.constant 0 : index
    %c0_2 = arith.constant 0 : index
    %1 = vector.load %arg5[%c0_1, %c0_2] : memref<64x1xf32, #tpu.memory_space<vmem>>, vector<64x1xf32>
    %2 = vector.shape_cast %1 : vector<64x1xf32> to vector<64x1xf32>
    %3 = vector.broadcast %2 : vector<64x1xf32> to vector<64x256xf32>
    %c0_3 = arith.constant 0 : index
    %c0_4 = arith.constant 0 : index
    %4 = vector.load %arg6[%c0_3, %c0_4] : memref<64x1xf32, #tpu.memory_space<vmem>>, vector<64x1xf32>
    %5 = vector.shape_cast %4 : vector<64x1xf32> to vector<64x1xf32>
    %6 = vector.broadcast %5 : vector<64x1xf32> to vector<64x256xf32>
    %c0_5 = arith.constant 0 : index
    %c0_6 = arith.constant 0 : index
    %7 = vector.load %arg7[%c0_5, %c0_6] : memref<1x1xf32, #tpu.memory_space<vmem>>, vector<1x1xf32>
    %8 = vector.shape_cast %7 : vector<1x1xf32> to vector<1x1xf32>
    %9 = vector.broadcast %8 : vector<1x1xf32> to vector<1x256xf32>
    %c0_7 = arith.constant 0 : index
    %c0_8 = arith.constant 0 : index
    %c0_9 = arith.constant 0 : index
    %10 = vector.load %arg2[%c0_7, %c0_8, %c0_9] : memref<1x4x256xf32, #tpu.memory_space<vmem>>, vector<1x4x256xf32>
    %11 = vector.shape_cast %10 : vector<1x4x256xf32> to vector<4x256xf32>
    %c0_10 = arith.constant 0 : index
    %c0_11 = arith.constant 0 : index
    %c0_12 = arith.constant 0 : index
    %12 = vector.load %arg3[%c0_10, %c0_11, %c0_12] : memref<1x4x256xf32, #tpu.memory_space<vmem>>, vector<1x4x256xf32>
    %13 = vector.shape_cast %12 : vector<1x4x256xf32> to vector<4x256xf32>
    %14 = tpu.concatenate %11, %13 in 0 : vector<4x256xf32>, vector<4x256xf32> -> vector<8x256xf32>
    %cst = arith.constant dense<0.000000e+00> : vector<64x256xf32>
    %15 = tpu.matmul %0, %14, %cst {dimension_numbers = #tpu.dot_dimension_numbers<[1], [0], [0], [1], [0, 0, 1, 1], [], []>} : vector<64x8xf32>, vector<8x256xf32>, vector<64x256xf32> -> vector<64x256xf32>
    %16 = arith.addf %15, %3 : vector<64x256xf32>
    %cst_13 = arith.constant 0.000000e+00 : f32
    %17 = vector.broadcast %cst_13 : f32 to vector<64x256xf32>
    %18 = arith.maximumf %16, %17 : vector<64x256xf32>
    %19 = arith.mulf %18, %6 : vector<64x256xf32>
    %cst_14 = arith.constant dense<0.000000e+00> : vector<256xf32>
    %20 = vector.multi_reduction <add>, %19, %cst_14 [0] : vector<64x256xf32> to vector<256xf32>
    %21 = vector.shape_cast %20 : vector<256xf32> to vector<1x256xf32>
    %22 = arith.addf %21, %9 : vector<1x256xf32>
    %23 = arith.negf %22 : vector<1x256xf32>
    %24 = math.exp %23 : vector<1x256xf32>
    %cst_15 = arith.constant 1.000000e+00 : f32
    %25 = vector.broadcast %cst_15 : f32 to vector<1x256xf32>
    %26 = arith.addf %25, %24 : vector<1x256xf32>
    %27 = arith.divf %25, %26 : vector<1x256xf32>
    %28 = vector.broadcast %27 : vector<1x256xf32> to vector<4x256xf32>
    %29 = arith.mulf %11, %28 : vector<4x256xf32>
    %c0_16 = arith.constant 0 : index
    %c0_17 = arith.constant 0 : index
    %c0_18 = arith.constant 0 : index
    %30 = vector.load %arg8[%c0_16, %c0_17, %c0_18] : memref<1x4x256xf32, #tpu.memory_space<vmem>>, vector<1x4x256xf32>
    %31 = vector.shape_cast %30 : vector<1x4x256xf32> to vector<4x256xf32>
    %32 = vector.shape_cast %29 : vector<4x256xf32> to vector<1x4x256xf32>
    tpu.vector_store %arg8[%c0_16, %c0_17, %c0_18], %32 {strides = array<i32>} : memref<1x4x256xf32, #tpu.memory_space<vmem>>, vector<1x4x256xf32>,
    return
  }
  func.func @transform_0(%arg0: i32, %arg1: i32) -> (i32, i32, i32) {
    %c0_i32 = arith.constant 0 : i32
    %c0_i32_0 = arith.constant 0 : i32
    return %arg0, %c0_i32, %arg1 : i32, i32, i32
  }
  func.func @transform_1(%arg0: i32, %arg1: i32) -> (i32, i32, i32) {
    %c0_i32 = arith.constant 0 : i32
    %c0_i32_0 = arith.constant 0 : i32
    return %arg0, %c0_i32, %arg1 : i32, i32, i32
  }
  func.func @transform_2(%arg0: i32, %arg1: i32) -> (i32, i32) {
    %c0_i32 = arith.constant 0 : i32
    %c0_i32_0 = arith.constant 0 : i32
    %c0_i32_1 = arith.constant 0 : i32
    return %c0_i32, %c0_i32_0 : i32, i32
  }
  func.func @transform_3(%arg0: i32, %arg1: i32) -> (i32, i32) {
    %c0_i32 = arith.constant 0 : i32
    %c0_i32_0 = arith.constant 0 : i32
    %c0_i32_1 = arith.constant 0 : i32
    return %c0_i32, %c0_i32_0 : i32, i32
  }
  func.func @transform_4(%arg0: i32, %arg1: i32) -> (i32, i32) {
    %c0_i32 = arith.constant 0 : i32
    %c0_i32_0 = arith.constant 0 : i32
    %c0_i32_1 = arith.constant 0 : i32
    return %c0_i32, %c0_i32_0 : i32, i32
  }
  func.func @transform_5(%arg0: i32, %arg1: i32) -> (i32, i32) {
    %c0_i32 = arith.constant 0 : i32
    %c0_i32_0 = arith.constant 0 : i32
    %c0_i32_1 = arith.constant 0 : i32
    return %c0_i32, %c0_i32_0 : i32, i32
  }
  func.func @transform_6(%arg0: i32, %arg1: i32) -> (i32, i32, i32) {
    %c0_i32 = arith.constant 0 : i32
    %c0_i32_0 = arith.constant 0 : i32
    return %arg0, %c0_i32, %arg1 : i32, i32, i32
  }
}

</mosaic_0001>

<bundles_post_ra>
// kernel: tpu_custom_call.1
= control target key start
LH: loop header
LB: loop body
LE: loop exit
PB: predicated region body
PF: predicated region fallthrough
CT: control target
= control target key end

     0   :  { %s1192_s0 = inlined_call_operand.vmem [shape: f32[2,4,256], index: 0, kind: input, shape index: {}]   ;;  %s1193_s1 = inlined_call_operand.vmem [shape: f32[2,4,256], index: 1, kind: input, shape index: {}]   ;;  %s1194_s2 = inlined_call_operand.vmem [shape: f32[64,8], index: 2, kind: input, shape index: {}]   ;;  %s1195_s3 = inlined_call_operand.vmem [shape: f32[64,1], index: 3, kind: input, shape index: {}]   ;;  %s1196_s4 = inlined_call_operand.vmem [shape: f32[64,1], index: 4, kind: input, shape index: {}]   ;;  %s1197_s5 = inlined_call_operand.<no memory space> [shape: f32[1,1], index: 5, kind: input, shape index: {}]   ;;  %s1198_s6 = inlined_call_operand.hbm [shape: f32[2,4,256], index: 6, kind: output, shape index: {}]  }
   0x1   :  { %v11_v0 = vstv %s1197_s5 }
   0x2   :  { %12 = vst [vmem:[#allocation2] sm:$0x1] %v11_v0 }
   0x3   :  { %13 = vsyncpa [#allocation4], 0 }
   0x4   :  { %15 = vsyncpa [#allocation4 + $0x1], 0  ;;  %s991_s23 = smov 0   ;;  %s993_s24 = smov 0  }
   0x5   :  { %s995_s25 = smov 0   ;;  %s997_s26 = smov 0  }
   0x6   :  { %s999_s27 = smov 0   ;;  %s1001_s28 = smov 0  }
   0x7 LB: > { %s771_s5 = sadd.s32 4294967295, %s948_s28   ;;  %s772_s29 = sadd.s32 4294967294, %s948_s28   ;;  %s948_s28 = sphi %s1001_s28, %s21_s28   ;;  %s944_s27 = sphi %s999_s27, %s1205_s27   ;;  %s940_s26 = sphi %s997_s26, %s1204_s26   ;;  %s936_s25 = sphi %s995_s25, %s1203_s25   ;;  %s932_s24 = sphi %s993_s24, %s1202_s24   ;;  %s928_s23 = sphi %s991_s23, %s1201_s23  }
   0x8   : > { %s33_s30 = sadd.s32 1, %s944_s27  ;;  %s182_s7 = sadd.s32 1, %s936_s25 }
   0x9   : > { %p35_p0 = scmp.ge.s32.totalorder %s33_s30, 2  ;;  %p192_p1 = scmp.ne.s32.totalorder %s936_s25, %s932_s24 }
   0xa   : > { %p193_p2 = scmp.eq.s32.totalorder %s771_s5, 1  ;;  %p198_p3 = scmp.ne.s32.totalorder %s932_s24, %s928_s23 }
   0xb   : > { %s1207_s30 = smov (%p35_p0, %s33_s30), 0  ;;  %p199_p5 = scmp.eq.s32.totalorder %s772_s29, 1 }
   0xc   : > { %p1031_p4 = por %p193_p2, %p192_p1  ;;  %s177_s9 = ssub.s32 %s944_s27, %s1207_s30 }
   0xd   : > { %p775_p6 = scmp.ge.s32.totalorder %s948_s28, 1  ;;  %p180_p7 = scmp.eq.s32.totalorder %s177_s9, 0 }
   0xe   : > { %p1038_p8 = por %p199_p5, %p198_p3  ;;  %p255_p9 = scmp.lt.s32.totalorder %s948_s28, 3 }
   0xf   : > { %s1044_s11 = scalar_select %p180_p7, %s936_s25, %s182_s7  }
  0x10   : > { %p256_p10 = pnand %p775_p6, %p255_p9 }
  0x11   : > { %p299_p11 = scmp.lt.s32.totalorder (!%p256_p10), %s940_s26, 1  ;;  %v950_v1 = vmov (!%p256_p10), 0.0   ;;  %v951_v2 = vmov (!%p256_p10), 0   ;;  %v327_v3 = vld [vmem:[%s1195_s3] sm:$0xff] (!%p256_p10)  ;;  %v329_v4 = vld [vmem:[%s1195_s3 + $0x10] sm:$0xff] (!%p256_p10)  ;;  %v328_v5 = vld [vmem:[%s1195_s3 + $0x8] sm:$0xff] (!%p256_p10) }
  0x12   : > { %259 = sbr.rel (%p256_p10) target bundleno = 334 (0x14e), region = 44  ;;  %533 = vmatprep.mubr.f32.mxu0 (!%p256_p10), %v950_v1  ;;  %557 = vmatprep.mubr.f32.mxu1 (!%p256_p10), %v950_v1  ;;  %v330_v6 = vld [vmem:[%s1195_s3 + $0x18] sm:$0xff] (!%p256_p10)  ;;  %vm441_vm0 = vcmask (!%p256_p10), 1043456   ;;  %v319_v13 = vld [vmem:[%s1194_s2] sm:$0xff] (!%p256_p10)  ;;  %vm444_vm1 = vcmask (!%p256_p10), 64512   ;;  %v376_v16 = vld [vmem:[%s1196_s4 + $0x8] sm:$0xff] (!%p256_p10) }
  0x13   : > { %858 = vset.pattern.permute.xlu0 (!%p256_p10), %v951_v2  ;;  %859 = vset.pattern.permute.xlu1 (!%p256_p10), %v951_v2  ;;  %v323_v14 = vld [vmem:[%s1194_s2 + $0x20] sm:$0xff] (!%p256_p10)  ;;  %v320_v17 = vld [vmem:[%s1194_s2 + $0x8] sm:$0xff] (!%p256_p10)  ;;  %v377_v20 = vld [vmem:[%s1196_s4 + $0x10] sm:$0xff] (!%p256_p10)  ;;  %s798_s7 = sshll.u32 (!%p256_p10), %s940_s26, 7 }
  0x14   : > { %337 = vperm.xlu0 (!%p256_p10), %858, %v327_v3   ;;  %347 = vperm.xlu1 (!%p256_p10), %859, %v329_v4   ;;  %v375_v15 = vld [vmem:[%s1196_s4] sm:$0xff] (!%p256_p10)  ;;  %v324_v18 = vld [vmem:[%s1194_s2 + $0x28] sm:$0xff] (!%p256_p10)  ;;  %v321_v21 = vld [vmem:[%s1194_s2 + $0x10] sm:$0xff] (!%p256_p10)  ;;  %s1145_s15 = scalar_lea.hbm (!%p256_p10), %s1198_s6, %s798_s7 }
  0x15   : > { %v331_v19 = vld [vmem:[%s1195_s3 + $0x20] sm:$0xff] (!%p256_p10)  ;;  %v325_v22 = vld [vmem:[%s1194_s2 + $0x30] sm:$0xff] (!%p256_p10)  ;;  %v332_v23 = vld [vmem:[%s1195_s3 + $0x28] sm:$0xff] (!%p256_p10) }
  0x16   : > { %v378_v24 = vld [vmem:[%s1196_s4 + $0x18] sm:$0xff] (!%p256_p10)  ;;  %v333_v27 = vld [vmem:[%s1195_s3 + $0x30] sm:$0xff] (!%p256_p10)  ;;  %v379_v28 = vld [vmem:[%s1196_s4 + $0x20] sm:$0xff] (!%p256_p10) }
  0x17   : > { %v322_v25 = vld [vmem:[%s1194_s2 + $0x18] sm:$0xff] (!%p256_p10)  ;;  %v380_v30 = vld [vmem:[%s1196_s4 + $0x28] sm:$0xff] (!%p256_p10)  ;;  %v381_v31 = vld [vmem:[%s1196_s4 + $0x30] sm:$0xff] (!%p256_p10) }
  0x18   : > { %342 = vperm.xlu0 (!%p256_p10), %858, %v328_v5   ;;  %352 = vperm.xlu1 (!%p256_p10), %859, %v330_v6   ;;  %v326_v26 = vld [vmem:[%s1194_s2 + $0x38] sm:$0xff] (!%p256_p10)  ;;  %v423_v33 = vld [vmem:[#allocation2] sm:$0x1] (!%p256_p10) }
  0x19   : > { %s300_s12 = scalar_select %p299_p11, %s940_s26, 1  ;;  %v334_v29 = vld [vmem:[%s1195_s3 + $0x38] sm:$0xff] }
  0x1a   : > { %v382_v32 = vld [vmem:[%s1196_s4 + $0x38] sm:$0xff]  ;;  %s952_s26 = smov [#allocation3]  }
  0x1b   : > { %s796_s17 = sshll.u32 %s300_s12, 3  ;;  %s874_s18 = sshll.u32 %s952_s26, 4  ;;  %s875_s18 = int_to_ptr.vmem [resolvable:$false] %s874_s18 }
  0x1c   : > { %s306_s20 = scalar_lea.vmem %s1192_s0, %s796_s17  ;;  %s316_s5 = scalar_lea.vmem %s1193_s1, %s796_s17  ;;  %385 = vperm.xlu0 %858, %v375_v15   ;;  %390 = vperm.xlu1 %859, %v376_v16  }
  0x1d   : > { %v1066_v7 = vld [vmem:[%s306_s20] sm:$0xff]  ;;  %s876_s19 = scalar_lea.vmem %s875_s18, 256 }
  0x1e   : > { %v434_v8 = vld [vmem:[%s316_s5] sm:$0xff]  ;;  %v436_v9 = vcombine.high %v1066_v7, %v1066_v7  ;;  %s295_s5 = sand.u32 1, %s932_s24  }
  0x1f   : > { %v439_v10 = vcombine.low %v434_v8, %v434_v8  ;;  %s776_s29 = sshll.u32 %s295_s5, 3  ;;  %s661_s16 = scalar_lea.sflag [#allocation4], %s295_s5 }
  0x20   : > { %v443_v11 = vsel %vm441_vm0, %v436_v9, %v434_v8  ;;  %357 = vperm.xlu0 %858, %v331_v19   ;;  %395 = vperm.xlu1 %859, %v377_v20   ;;  %s297_s9 = scalar_lea.vmem [#allocation3], %s776_s29 }
  0x21   : > { %v442_v12 = vsel %vm441_vm0, %v1066_v7, %v439_v10  ;;  %469 = vmatprep.subr.mxu0 %v443_v11  ;;  %799 = vmatprep.subr.mxu1 %v443_v11  ;;  %s677_s13 = sshll.u32 %s297_s9, 4  ;;  %s1147_s13 = int_to_ptr.vmem [resolvable:$true] %s677_s13 }
  0x22   : > { %470 = vmatpush1.msra.mxu0 %v442_v12  ;;  %800 = vmatpush1.msra.mxu1 %v442_v12  ;;  %s870_s17 = scalar_lea.vmem %s1147_s13, 128  ;;  %p877_p1 = scmp.lt.s32.totalorder %s1147_s13, %s875_s18 }
  0x23   : > { %781 = vmatmul.mubr.msk.f32.vlgmr.msra.gmra.mrb[0].mxu0 %vm444_vm1, %v319_v13  ;;  %785 = vmatmul.mubr.msk.f32.vlgmr.msra.gmra.mrb[0].mxu1 %vm444_vm1, %v323_v14  ;;  %p871_p12 = scmp.ne.s32.totalorder %s1147_s13, %s870_s17  ;;  %p878_p2 = scmp.lt.s32.totalorder %s876_s19, %s870_s17 }
  0x24   : > { %539 = vmatprep.mubr.f32.mxu0 %v950_v1  ;;  %563 = vmatprep.mubr.f32.mxu1 %v950_v1 }
  0x25   : > { %362 = vperm.xlu0 %858, %v332_v23   ;;  %400 = vperm.xlu1 %859, %v378_v24   ;;  %p872_p13 = pnand %p871_p12, %p1031_p4  ;;  %p879_p3 = por %p878_p2, %p877_p1 }
  0x27   : > { %782 = vmatmul.mubr.msk.f32.gmra.mrb[2].mxu0 %vm444_vm1, %v320_v17  ;;  %786 = vmatmul.mubr.msk.f32.gmra.mrb[2].mxu1 %vm444_vm1, %v324_v18  ;;  %p873_p0 = pneg %p872_p13 }
  0x28   : > { %545 = vmatprep.mubr.f32.mxu0 %v950_v1  ;;  %569 = vmatprep.mubr.f32.mxu1 %v950_v1 }
  0x29   : > { %367 = vperm.xlu0 %858, %v333_v27   ;;  %405 = vperm.xlu1 %859, %v379_v28   ;;  %p880_p5 = pnand %p879_p3, %p873_p0 }
  0x2b   : > { %783 = vmatmul.mubr.msk.f32.gmra.mrb[4].mxu0 %vm444_vm1, %v321_v21  ;;  %787 = vmatmul.mubr.msk.f32.gmra.mrb[4].mxu1 %vm444_vm1, %v325_v22 }
  0x2c   : > { %551 = vmatprep.mubr.f32.mxu0 %v950_v1  ;;  %575 = vmatprep.mubr.f32.mxu1 %v950_v1 }
  0x2d   : > { %372 = vperm.xlu0 %858, %v334_v29   ;;  %410 = vperm.xlu1 %859, %v380_v30  }
  0x2f   : > { %784 = vmatmul.mubr.msk.f32.gmra.mrb[6].mxu0 %vm444_vm1, %v322_v25  ;;  %788 = vmatmul.mubr.msk.f32.gmra.mrb[6].mxu1 %vm444_vm1, %v326_v26 }
  0x31   : > { %415 = vperm.xlu0 %858, %v381_v31   ;;  %420 = vperm.xlu1 %859, %v382_v32  }
  0x35   : > { %426 = vperm.xlu0 %858, %v423_v33  }
  0x93   : > { %v338_v34 = vpop.permute.xlu0 %337  ;;  %v348_v35 = vpop.permute.xlu1 %347 }
  0x97   : > { %v343_v36 = vpop.permute.xlu0 %342  ;;  %v353_v37 = vpop.permute.xlu1 %352 }
  0x9b   : > { %v386_v38 = vpop.permute.xlu0 %385  ;;  %v391_v39 = vpop.permute.xlu1 %390 }
  0x9f   : > { %v358_v40 = vpop.permute.xlu0 %357  ;;  %v396_v41 = vpop.permute.xlu1 %395 }
  0xa4   : > { %v363_v48 = vpop.permute.xlu0 %362  ;;  %v401_v49 = vpop.permute.xlu1 %400 }
  0xa8   : > { %v368_v3 = vpop.permute.xlu0 %367  ;;  %v406_v8 = vpop.permute.xlu1 %405 }
  0xac   : > { %v373_v29 = vpop.permute.xlu0 %372 }
  0xf6   : > { %v535_v42 = vpop.f32.mrb[0].mxu0  ;;  %v559_v43 = vpop.f32.mrb[0].mxu1 }
  0xf7   : > { %v536_v44 = vadd.f32 %v535_v42, %v338_v34  ;;  %v537_v45 = vpop.f32.mrb[1].mxu0  ;;  %v561_v46 = vpop.f32.mrb[1].mxu1  ;;  %v560_v9 = vadd.f32 %v559_v43, %v358_v40 }
  0xf8   : > { %v538_v47 = vadd.f32 %v537_v45, %v338_v34  ;;  %v562_v12 = vadd.f32 %v561_v46, %v358_v40 }
  0xf9   : > { %v582_v52 = vmax.f32 %v536_v44, 0.0  ;;  %v590_v25 = vmax.f32 %v560_v9, 0.0 }
  0xfa   : > { %v541_v50 = vpop.f32.mrb[2].mxu0  ;;  %v565_v51 = vpop.f32.mrb[2].mxu1  ;;  %v583_v56 = vmax.f32 %v538_v47, 0.0  ;;  %v591_v30 = vmax.f32 %v562_v12, 0.0 }
  0xfb   : > { %v542_v53 = vadd.f32 %v541_v50, %v343_v36  ;;  %v543_v54 = vpop.f32.mrb[3].mxu0  ;;  %v567_v55 = vpop.f32.mrb[3].mxu1  ;;  %v598_v62 = vmul.f32 %v582_v52, %v386_v38  ;;  %v566_v17 = vadd.f32 %v565_v51, %v363_v48  ;;  %v606_v43 = vmul.f32 %v590_v25, %v406_v8 }
  0xfc   : > { %v544_v57 = vadd.f32 %v543_v54, %v343_v36  ;;  %v599_v4 = vmul.f32 %v583_v56, %v386_v38  ;;  %v568_v22 = vadd.f32 %v567_v55, %v363_v48  ;;  %v411_v38 = vpop.permute.xlu1 %410  ;;  %v416_v51 = vpop.permute.xlu0 %415 }
  0xfd   : > { %v584_v58 = vmax.f32 %v542_v53, 0.0  ;;  %v592_v34 = vmax.f32 %v566_v17, 0.0 }
  0xfe   : > { %v585_v59 = vmax.f32 %v544_v57, 0.0  ;;  %v547_v60 = vpop.f32.mrb[4].mxu0  ;;  %v571_v61 = vpop.f32.mrb[4].mxu1 }
  0xff   : > { %v600_v63 = vmul.f32 %v584_v58, %v391_v39  ;;  %v548_v0 = vadd.f32 %v547_v60, %v348_v35  ;;  %v549_v1 = vpop.f32.mrb[5].mxu0  ;;  %v573_v2 = vpop.f32.mrb[5].mxu1  ;;  %v572_v27 = vadd.f32 %v571_v61, %v368_v3  ;;  %v608_v47 = vmul.f32 %v592_v34, %v411_v38 }
 0x100   : > { %v601_v5 = vmul.f32 %v585_v59, %v391_v39  ;;  %v550_v6 = vadd.f32 %v549_v1, %v348_v35  ;;  %v574_v32 = vadd.f32 %v573_v2, %v368_v3  ;;  %v593_v39 = vmax.f32 %v568_v22, 0.0  ;;  %v421_v57 = vpop.permute.xlu1 %420  ;;  %v427_v12 = vpop.permute.xlu0 %426 }
 0x101   : > { %v614_v10 = vadd.f32 %v600_v63, %v598_v62  ;;  %v586_v11 = vmax.f32 %v548_v0, 0.0  ;;  %v594_v44 = vmax.f32 %v572_v27, 0.0  ;;  %v429_v63 = vlaneseq }
 0x102   : > { %v627_v13 = vadd.f32 %v601_v5, %v599_v4  ;;  %v587_v14 = vmax.f32 %v550_v6, 0.0  ;;  %v553_v15 = vpop.f32.mrb[6].mxu0  ;;  %v577_v16 = vpop.f32.mrb[6].mxu1  ;;  %v595_v45 = vmax.f32 %v574_v32, 0.0  ;;  %v609_v52 = vmul.f32 %v593_v39, %v411_v38 }
 0x103   : > { %v602_v18 = vmul.f32 %v586_v11, %v396_v41  ;;  %v554_v19 = vadd.f32 %v553_v15, %v353_v37  ;;  %v555_v20 = vpop.f32.mrb[7].mxu0  ;;  %v579_v21 = vpop.f32.mrb[7].mxu1  ;;  %v578_v36 = vadd.f32 %v577_v16, %v373_v29  ;;  %v610_v55 = vmul.f32 %v594_v44, %v416_v51 }
 0x104   : > { %v603_v23 = vmul.f32 %v587_v14, %v396_v41  ;;  %v556_v24 = vadd.f32 %v555_v20, %v353_v37  ;;  %v580_v42 = vadd.f32 %v579_v21, %v373_v29  ;;  %v607_v37 = vmul.f32 %v591_v30, %v406_v8 }
 0x105   : > { %v615_v26 = vadd.f32 %v614_v10, %v602_v18  ;;  %v588_v28 = vmax.f32 %v554_v19, 0.0  ;;  %v596_v50 = vmax.f32 %v578_v36, 0.0  ;;  %v611_v58 = vmul.f32 %v595_v45, %v416_v51 }
 0x106   : > { %v628_v31 = vadd.f32 %v627_v13, %v603_v23  ;;  %v589_v33 = vmax.f32 %v556_v24, 0.0  ;;  %v597_v54 = vmax.f32 %v580_v42, 0.0  ;;  %v430_v4 = vshrl.u32 %v429_v63, 7 }
 0x107   : > { %v604_v35 = vmul.f32 %v588_v28, %v401_v49 }
 0x108   : > { %v605_v40 = vmul.f32 %v589_v33, %v401_v49  ;;  %v612_v49 = vmul.f32 %v596_v50, %v421_v57  ;;  %v613_v61 = vmul.f32 %v597_v54, %v421_v57  ;;  %v431_v10 = vsub.s32 0, %v430_v4 }
 0x109   : > { %v616_v41 = vadd.f32 %v615_v26, %v604_v35 }
 0x10a   : > { %v629_v46 = vadd.f32 %v628_v31, %v605_v40  ;;  %v432_v16 = vrot.slane %v427_v12, %v431_v10 }
 0x10b   : > { %v617_v48 = vadd.f32 %v616_v41, %v606_v43 }
 0x10c   : > { %v630_v53 = vadd.f32 %v629_v46, %v607_v37 }
 0x10d   : > { %v618_v56 = vadd.f32 %v617_v48, %v608_v47 }
 0x10e   : > { %v631_v59 = vadd.f32 %v630_v53, %v609_v52 }
 0x10f   : > { %v619_v60 = vadd.f32 %v618_v56, %v610_v55 }
 0x110   : > { %v632_v62 = vadd.f32 %v631_v59, %v611_v58 }
 0x111   : > { %v620_v0 = vadd.f32 %v619_v60, %v612_v49 }
 0x112   : > { %v633_v1 = vadd.f32 %v632_v62, %v613_v61 }
 0x113   : > { %v621_v2 = vrot.slane %v620_v0, 4 }
 0x114   : > { %v634_v3 = vrot.slane %v633_v1, 4 }
 0x115   : > { %v622_v5 = vadd.f32 %v621_v2, %v620_v0 }
 0x116   : > { %v635_v6 = vadd.f32 %v634_v3, %v633_v1 }
 0x117   : > { %v623_v8 = vrot.slane %v622_v5, 2 }
 0x118   : > { %v636_v9 = vrot.slane %v635_v6, 2 }
 0x119   : > { %v624_v11 = vadd.f32 %v623_v8, %v622_v5 }
 0x11a   : > { %v637_v13 = vadd.f32 %v636_v9, %v635_v6 }
 0x11b   : > { %v625_v14 = vrot.slane %v624_v11, 1 }
 0x11c   : > { %v638_v15 = vrot.slane %v637_v13, 1 }
 0x11d   : > { %v626_v17 = vadd.f32 %v625_v14, %v624_v11 }
 0x11e   : > { %v639_v18 = vadd.f32 %v638_v15, %v637_v13 }
 0x11f   : > { %v640_v19 = vadd.f32 %v626_v17, %v432_v16 }
 0x120   : > { %v641_v20 = vadd.f32 %v639_v18, %v432_v16 }
 0x121   : > { %v789_v21 = vmul.f32 -1.442695, %v640_v19 }
 0x122   : > { %v790_v22 = vmul.f32 -1.442695, %v641_v20 }
 0x123   : > { %862 = vpow2.f32 %v789_v21 }
 0x124   : > { %864 = vpow2.f32 %v790_v22 }
 0x12d   : > { %v863_v23 = vpop.eup %862 }
 0x12e   : > { %v865_v24 = vpop.eup %864  ;;  %v648_v25 = vadd.f32 1.0, %v863_v23 }
 0x12f   : > { %v649_v26 = vadd.f32 1.0, %v865_v24 }
 0x130   : > { %866 = vrcp.f32 %v648_v25 }
 0x131   : > { %868 = vrcp.f32 %v649_v26 }
 0x13a   : > { %v867_v27 = vpop.eup %866 }
 0x13b   : > { %v869_v28 = vpop.eup %868 }
 0x13c   : > { %v656_v29 = vcombine.low %v867_v27, %v869_v28 }
 0x13e   : > { %v658_v30 = vmul.f32 %v656_v29, %v1066_v7 }
 0x140   : > { %659 = vst [vmem:[%s297_s9] sm:$0xff] %v658_v30 }
 0x141   : > { %883 = shalt.err (!%p880_p5)
}
 0x142   : > { %s884_s20 = scalar_lea.hbm %s1145_s15, 128  ;;  %s888_s5 = scalar_lea.hbm %s1198_s6, 256 }
 0x143   : > { %p885_p6 = scmp.ne.s32.totalorder %s1145_s15, %s884_s20  ;;  %p889_p10 = scmp.lt.u32.totalorder %s1145_s15, %s1198_s6 }
 0x144   : > { %p890_p11 = scmp.lt.u32.totalorder %s888_s5, %s884_s20  ;;  %p892_p13 = scmp.lt.u32.totalorder %s884_s20, %s1145_s15 }
 0x145   : > { %p886_p7 = pnand %p885_p6, %p1031_p4 }
 0x146   : > { %p891_p12 = por %p890_p11, %p889_p10 }
 0x147   : > { %p887_p9 = pneg %p886_p7 }
 0x148   : > { %p893_p0 = por %p892_p13, %p891_p12 }
 0x14a   : > { %p894_p1 = pnand %p893_p0, %p887_p9 }
 0x14c   : > { %897 = shalt.err (!%p894_p1)
}
 0x14d   : > { %801 = dma.vmem_to_hbm [thread:$0]  (%p1031_p4), %s1147_s13, 128, %s1145_s15, %s661_s16  }
 0x14e PF: > { %p807_p2 = scmp.ge.s32.totalorder %s948_s28, 2  ;;  %s689_s9 = sand.u32 1, %s928_s23  }
 0x14f   : > { %s690_s12 = scalar_lea.sflag [#allocation4], %s689_s9 }
 0x150   : > { %p804_p3 = pnand %p807_p2, %p1038_p8 }
 0x152   : > { %923 = dma.done.wait (!%p804_p3), %s690_s12, 128  }
 0x153   : > { %925 = vsyncadd (!%p804_p3), %s690_s12, 4294967168  ;;  %s21_s28 = sadd.s32 1, %s948_s28   ;;  %s1201_s23 = smov %s932_s24 }
 0x154   : > { %p18_p5 = scmp.ge.s32.totalorder %s21_s28, 4   ;;  %s1202_s24 = smov %s936_s25 }
 0x155   : > { %s1203_s25 = smov %s1044_s11  ;;  %s1204_s26 = smov %s944_s27 }
 0x156   : > { %s1205_s27 = smov %s1207_s30  ;;  %20 = sbr.rel (!%p18_p5) target bundleno = 7 (0x7), region = 82 }
 0x15d   :  { %695 = vsyncpa [#allocation4], 1 }
 0x15e   :  { %697 = vsyncpa [#allocation4 + $0x1], 1 }

</bundles_post_ra>
